<compile_context>
chip_gen: v7x
topology: tpu7x:2x2x1
jax: 0.10.0
libtpu: 0.0.40
codegen_flags: <defaults>
</compile_context>

<pallas_src>
import functools
import math

import numpy as np

import jax
import jax.numpy as jnp
from jax import lax
from jax.experimental import pallas as pl
from jax.experimental.pallas import tpu as pltpu


def _round_up(x, m):
    return ((x + m - 1) // m) * m


def _conv_relu_maxpool_kernel(xm_ref, xh_ref, w_ref, b_ref, lim_ref, o_ref, *,
                              k_max, t_out, in_ch):
    """One (batch-tile, time-tile) step: all Conv1d branches -> ReLU -> mask -> max.

    xm_ref : (bb, t_out, C)     bf16  main x window for this time tile
    xh_ref : (bb, halo, C)      bf16  halo = first rows of the next time tile
    w_ref  : (k_max*C, N_pad)   bf16  packed weights for all branches
    b_ref  : (1, N_pad)         f32   packed bias
    lim_ref: (1, N_pad)         i32   per-column valid-position limit (L - k + 1)
    o_ref  : (bb, N_pad)        f32   running max over time (resident across t)
    """
    t = pl.program_id(1)

    # Stitch main + halo so every window starting inside this tile is available.
    xw = jnp.concatenate([xm_ref[...], xh_ref[...]], axis=1)  # (bb, t_out+halo, C)

    # Shift-and-accumulate conv-as-matmul (no lane-axis im2col concat).
    acc = None
    for j in range(k_max):
        xj = xw[:, j:j + t_out, :]                              # (bb, t_out, C)
        wj = w_ref[j * in_ch:(j + 1) * in_ch, :]                # (C, N_pad)
        term = lax.dot_general(
            xj, wj,
            dimension_numbers=(((2,), (0,)), ((), ())),
            preferred_element_type=jnp.float32)                 # (bb, t_out, N_pad)
        acc = term if acc is None else acc + term

    acc = jnp.maximum(acc + b_ref[...], 0.0)                    # bias + ReLU (f32)

    # In-kernel validity mask: global position p is real for a column whose
    # branch kernel size is k iff p < L - k + 1.  ReLU output >= 0, so zeroing
    # the invalid tail never changes the max.
    n_pad = acc.shape[-1]
    pos = lax.broadcasted_iota(jnp.int32, (t_out, n_pad), 0) + t * t_out
    valid = pos < lim_ref[...]                                  # (t_out, N_pad)
    acc = jnp.where(valid[None], acc, 0.0)

    tile_max = jnp.max(acc, axis=1)                             # (bb, N_pad)

    @pl.when(t == 0)
    def _():
        o_ref[...] = jnp.zeros_like(o_ref)                      # identity for ReLU'd max
    o_ref[...] = jnp.maximum(o_ref[...], tile_max)


def fused_conv_relu_maxpool(x, w_big, b_big, lim_row, *, k_max, in_ch,
                            t_out, halo, bb):
    """One pallas_call for the whole cnn_extractor forward.

    x      : (B_pad, L_pad, C)   bf16, B_pad % bb == 0, L_pad == n_t*t_out + halo
    w_big  : (k_max*C, N_pad)    bf16
    b_big  : (1, N_pad)          f32
    lim_row: (1, N_pad)          int32
    returns: (B_pad, N_pad)      f32
    """
    b_pad, l_pad, c = x.shape
    k_dim, n_pad = w_big.shape
    n_b = b_pad // bb
    n_t = (l_pad - halo) // t_out
    t_in = t_out + halo

    # Per-step VMEM estimate: double-buffered bf16 x tiles + f32 activation/temps.
    est = (2 * 2 * bb * t_in * c * 2            # x main + halo, 2 buffers each
           + 2 * k_dim * n_pad * 2              # weights (resident)
           + 3 * bb * t_out * n_pad * 4         # activation + dot temps
           + 2 * bb * n_pad * 4                 # output / tile max
           + 2 * n_pad * 8)                     # bias + limits
    vmem_limit = int(min(48 * 1024 * 1024, max(16 * 1024 * 1024, 2 * est)))

    flops = 2 * b_pad * n_t * t_out * k_dim * n_pad
    bytes_accessed = int(x.size * x.dtype.itemsize + w_big.size * 2
                         + b_big.size * 4 + lim_row.size * 4 + b_pad * n_pad * 4)

    return pl.pallas_call(
        functools.partial(_conv_relu_maxpool_kernel,
                          k_max=k_max, t_out=t_out, in_ch=in_ch),
        out_shape=jax.ShapeDtypeStruct((b_pad, n_pad), jnp.float32),
        grid=(n_b, n_t),
        in_specs=[
            # main x window: new block per (batch tile, time tile)
            pl.BlockSpec((bb, t_out, c), lambda b, t: (b, t, 0)),
            # halo: first `halo` rows of the *next* time tile (plain Blocked spec)
            pl.BlockSpec((bb, halo, c),
                         lambda b, t: (b, (t + 1) * (t_out // halo), 0)),
            # weights / bias / limits: constant block index -> stay resident,
            # never re-DMA'd across the time (or batch) axis.
            pl.BlockSpec((k_dim, n_pad), lambda b, t: (0, 0)),
            pl.BlockSpec((1, n_pad), lambda b, t: (0, 0)),
            pl.BlockSpec((1, n_pad), lambda b, t: (0, 0)),
        ],
        out_specs=pl.BlockSpec((bb, n_pad), lambda b, t: (b, 0)),
        compiler_params=pltpu.CompilerParams(
            dimension_semantics=("parallel", "arbitrary"),
            vmem_limit_bytes=vmem_limit),
        cost_estimate=pl.CostEstimate(
            flops=flops, transcendentals=0, bytes_accessed=bytes_accessed),
    )(x, x, w_big, b_big, lim_row)


def _choose_tiles(b_sz, l_out, halo, n_pad, max_t_out):
    """Pick (bb, n_b, t_out, n_t) from a VMEM budget + megacore considerations."""
    t_out = max(halo, min(_round_up(max_t_out, halo), _round_up(l_out, halo)))
    n_t = pl.cdiv(l_out, t_out)
    # Batch tile: multiple of 8 sublanes, capped so the f32 activation tile
    # stays ~<= 8 MiB (fits v7x's 64 MiB VMEM with double-buffering headroom).
    bb_cap = max(8, ((8 << 20) // (t_out * n_pad * 4)) // 8 * 8)
    bb = max(8, min(64, bb_cap, _round_up(b_sz, 8)))
    n_b = pl.cdiv(b_sz, bb)
    if b_sz >= 2 and n_b < 2:
        # v7x has 2 TensorCores: give the 'parallel' batch axis >= 2 grid steps.
        n_b = 2
        bb = max(8, _round_up(pl.cdiv(b_sz, 2), 8))
    return bb, n_b, t_out, n_t


class CnnExtractorPallas:
    """JAX/Pallas port of DHEM-FND cnn_extractor (all Conv1d branches fused)."""

    def __init__(self, feature_kernel, input_size, key):
        self.input_size = input_size
        self.branches = []                    # (k, w(k,C,n) f32, b(1,n) f32) for ref
        ks = list(feature_kernel.keys())
        self.k_max = max(ks)
        self.k_min = min(ks)
        self.halo = max(8, _round_up(self.k_max - 1, 8))
        self.n_total = sum(feature_kernel.values())
        # Pad the filter axis to a lane-dense multiple of 128.
        self.n_pad = max(128, _round_up(self.n_total, 128))

        c = input_size
        w_big = np.zeros((self.k_max * c, self.n_pad), np.float32)
        b_big = np.zeros((1, self.n_pad), np.float32)
        col_k = np.full((self.n_pad,), self.k_max, np.int32)   # kernel size per column

        off = 0
        for kernel, num in feature_kernel.items():
            key, k_w, k_b = jax.random.split(key, 3)
            # PyTorch Conv1d default init: U(-1/sqrt(fan_in), 1/sqrt(fan_in)),
            # fan_in = in_channels * kernel_size.  PyTorch layout is
            # (num, C, kernel); we keep the transposed (kernel, C, num).
            bound = 1.0 / math.sqrt(input_size * kernel)
            w = jax.random.uniform(k_w, (kernel, input_size, num),
                                   jnp.float32, -bound, bound)
            b = jax.random.uniform(k_b, (1, num), jnp.float32, -bound, bound)
            self.branches.append((kernel, w, b))

            w_np = np.asarray(w)
            for j in range(kernel):            # zero-pad window dim to k_max
                w_big[j * c:(j + 1) * c, off:off + num] = w_np[j]
            b_big[0, off:off + num] = np.asarray(b)[0]
            col_k[off:off + num] = kernel
            off += num

        self.w_big = jnp.asarray(w_big, dtype=jnp.bfloat16)   # (k_max*C, N_pad) bf16
        self.b_big = jnp.asarray(b_big)                       # (1, N_pad) f32
        self.col_k = jnp.asarray(col_k)                       # (N_pad,) int32

    def __call__(self, x, max_t_out=512):
        # x: (B, L, input_size) -- the PyTorch forward's input (pre-permute)
        b_sz, seq_len, c = x.shape
        assert c == self.input_size
        if seq_len < self.k_max:
            # Matches PyTorch behavior: Conv1d would fail for seq_len < kernel.
            raise ValueError("seq_len must be >= the largest kernel size")

        l_out = seq_len - self.k_min + 1       # longest branch output length
        bb, n_b, t_out, n_t = _choose_tiles(b_sz, l_out, self.halo,
                                            self.n_pad, max_t_out)

        # Pad batch to a whole number of batch tiles and time so every main +
        # halo block is in-bounds; padded rows/positions are masked / discarded.
        b_pad = n_b * bb
        l_pad = n_t * t_out + self.halo
        x_pad = jnp.pad(x, ((0, b_pad - b_sz), (0, l_pad - seq_len), (0, 0)))
        # TODO(synk): when input_size < 128 the lane dim is under-filled (C/128
        # lane utilization for the x stream); folding time steps into lanes
        # would complicate the tap shifts, so it is left as-is.
        x_bf16 = x_pad.astype(jnp.bfloat16)

        # Per-column valid-position limit: position p is real for a branch with
        # kernel k iff p < L - k + 1.  (Padded columns have zero weight/bias.)
        lim_row = (seq_len - self.col_k + 1).astype(jnp.int32)[None, :]

        out = fused_conv_relu_maxpool(x_bf16, self.w_big, self.b_big, lim_row,
                                      k_max=self.k_max, in_ch=c,
                                      t_out=t_out, halo=self.halo, bb=bb)
        # Drop batch padding and lane padding (== the PyTorch concat of branches).
        return out[:b_sz, :self.n_total]


def _reference_forward(x, branches):
    """Pure-JAX f32 reference (same math, no Pallas) for a correctness check."""
    outs = []
    for k, w, b in branches:
        _, seq_len, _ = x.shape
        l_out = seq_len - k + 1
        acc = sum(jnp.einsum("blc,cn->bln", x[:, j:j + l_out, :], w[j])
                  for j in range(k)) + b
        acc = jnp.maximum(acc, 0.0)
        outs.append(acc.max(axis=1))
    return jnp.concatenate(outs, axis=1)


if __name__ == "__main__":
    key = jax.random.PRNGKey(0)
    k_x, k_x2, k_p = jax.random.split(key, 3)

    # Small shapes consistent with the module: batch=2, seq=8, input_size=32.
    B, L, C = 2, 8, 32
    feature_kernel = {3: 16, 4: 16, 5: 16}   # {kernel_size: num_filters}

    model = CnnExtractorPallas(feature_kernel, C, k_p)

    # Case 1: single time tile.
    x = jax.random.normal(k_x, (B, L, C), jnp.float32)
    out = jax.block_until_ready(model(x))
    assert out.shape == (B, sum(feature_kernel.values())), out.shape
    ref = _reference_forward(x, model.branches)
    # bf16 streaming of x / weights (f32 accumulation) => loosened tolerance.
    assert jnp.allclose(out, ref, atol=5e-2, rtol=5e-2), "Pallas/reference mismatch"

    # Case 2: force several time tiles (exercises halo + running-max accumulator).
    L2 = 24
    x2 = jax.random.normal(k_x2, (B, L2, C), jnp.float32)
    out2 = jax.block_until_ready(model(x2, max_t_out=8))
    ref2 = _reference_forward(x2, model.branches)
    assert out2.shape == ref2.shape, (out2.shape, ref2.shape)
    assert jnp.allclose(out2, ref2, atol=5e-2, rtol=5e-2), "Pallas/reference mismatch (tiled)"

    print("KERNEL_OK")
</pallas_src>

<mosaic_0001>
module attributes {stable_mosaic.version = 11 : i64} {
  func.func @_conv_relu_maxpool_kernel(%arg0: i32, %arg1: i32, %arg2: memref<8x8x32xbf16, #tpu.memory_space<vmem>>, %arg3: memref<8x8x32xbf16, #tpu.memory_space<vmem>>, %arg4: memref<160x128xbf16, #tpu.memory_space<vmem>>, %arg5: memref<1x128xf32, #tpu.memory_space<vmem>>, %arg6: memref<1x128xi32, #tpu.memory_space<vmem>>, %arg7: memref<8x128xf32, #tpu.memory_space<vmem>>) attributes {dimension_semantics = [#tpu.dimension_semantics<parallel>, #tpu.dimension_semantics<arbitrary>], iteration_bounds = array<i64: 2, 1>, scalar_prefetch = 0 : i64, scratch_operands = 0 : i64, tpu.core_type = #tpu.core_type<tc>, window_params = [{transform_indices = @transform_0, window_bounds = array<i64: 8, 8, 32>}, {transform_indices = @transform_1, window_bounds = array<i64: 8, 8, 32>}, {pipeline_mode = #tpu.pipeline_mode<synchronous>, transform_indices = @transform_2, window_bounds = array<i64: 160, 128>}, {pipeline_mode = #tpu.pipeline_mode<synchronous>, transform_indices = @transform_3, window_bounds = array<i64: 1, 128>}, {pipeline_mode = #tpu.pipeline_mode<synchronous>, transform_indices = @transform_4, window_bounds = array<i64: 1, 128>}, {transform_indices = @transform_5, window_bounds = array<i64: 8, 128>}]} {
    %c0 = arith.constant 0 : index
    %c0_0 = arith.constant 0 : index
    %c0_1 = arith.constant 0 : index
    %0 = vector.load %arg2[%c0, %c0_0, %c0_1] : memref<8x8x32xbf16, #tpu.memory_space<vmem>>, vector<8x8x32xbf16>
    %c0_2 = arith.constant 0 : index
    %c0_3 = arith.constant 0 : index
    %c0_4 = arith.constant 0 : index
    %1 = vector.load %arg3[%c0_2, %c0_3, %c0_4] : memref<8x8x32xbf16, #tpu.memory_space<vmem>>, vector<8x8x32xbf16>
    %2 = tpu.concatenate %0, %1 in 1 : vector<8x8x32xbf16>, vector<8x8x32xbf16> -> vector<8x16x32xbf16>
    %3 = vector.extract_strided_slice %2 {offsets = [0, 0, 0], sizes = [8, 8, 32], strides = [1, 1, 1]} : vector<8x16x32xbf16> to vector<8x8x32xbf16>
    %c0_5 = arith.constant 0 : index
    %c0_6 = arith.constant 0 : index
    %4 = vector.load %arg4[%c0_5, %c0_6] : memref<160x128xbf16, #tpu.memory_space<vmem>>, vector<32x128xbf16>
    %cst = arith.constant dense<0.000000e+00> : vector<8x8x128xf32>
    %5 = tpu.matmul %3, %4, %cst {dimension_numbers = #tpu.dot_dimension_numbers<[2], [0], [0, 1], [1], [0, 0, 0, 1, 1, 1], [], []>} : vector<8x8x32xbf16>, vector<32x128xbf16>, vector<8x8x128xf32> -> vector<8x8x128xf32>
    %6 = vector.extract_strided_slice %2 {offsets = [0, 1, 0], sizes = [8, 8, 32], strides = [1, 1, 1]} : vector<8x16x32xbf16> to vector<8x8x32xbf16>
    %c32 = arith.constant 32 : index
    %c0_7 = arith.constant 0 : index
    %7 = vector.load %arg4[%c32, %c0_7] : memref<160x128xbf16, #tpu.memory_space<vmem>>, vector<32x128xbf16>
    %cst_8 = arith.constant dense<0.000000e+00> : vector<8x8x128xf32>
    %8 = tpu.matmul %6, %7, %cst_8 {dimension_numbers = #tpu.dot_dimension_numbers<[2], [0], [0, 1], [1], [0, 0, 0, 1, 1, 1], [], []>} : vector<8x8x32xbf16>, vector<32x128xbf16>, vector<8x8x128xf32> -> vector<8x8x128xf32>
    %9 = arith.addf %5, %8 : vector<8x8x128xf32>
    %10 = vector.extract_strided_slice %2 {offsets = [0, 2, 0], sizes = [8, 8, 32], strides = [1, 1, 1]} : vector<8x16x32xbf16> to vector<8x8x32xbf16>
    %c64 = arith.constant 64 : index
    %c0_9 = arith.constant 0 : index
    %11 = vector.load %arg4[%c64, %c0_9] : memref<160x128xbf16, #tpu.memory_space<vmem>>, vector<32x128xbf16>
    %cst_10 = arith.constant dense<0.000000e+00> : vector<8x8x128xf32>
    %12 = tpu.matmul %10, %11, %cst_10 {dimension_numbers = #tpu.dot_dimension_numbers<[2], [0], [0, 1], [1], [0, 0, 0, 1, 1, 1], [], []>} : vector<8x8x32xbf16>, vector<32x128xbf16>, vector<8x8x128xf32> -> vector<8x8x128xf32>
    %13 = arith.addf %9, %12 : vector<8x8x128xf32>
    %14 = vector.extract_strided_slice %2 {offsets = [0, 3, 0], sizes = [8, 8, 32], strides = [1, 1, 1]} : vector<8x16x32xbf16> to vector<8x8x32xbf16>
    %c96 = arith.constant 96 : index
    %c0_11 = arith.constant 0 : index
    %15 = vector.load %arg4[%c96, %c0_11] : memref<160x128xbf16, #tpu.memory_space<vmem>>, vector<32x128xbf16>
    %cst_12 = arith.constant dense<0.000000e+00> : vector<8x8x128xf32>
    %16 = tpu.matmul %14, %15, %cst_12 {dimension_numbers = #tpu.dot_dimension_numbers<[2], [0], [0, 1], [1], [0, 0, 0, 1, 1, 1], [], []>} : vector<8x8x32xbf16>, vector<32x128xbf16>, vector<8x8x128xf32> -> vector<8x8x128xf32>
    %17 = arith.addf %13, %16 : vector<8x8x128xf32>
    %18 = vector.extract_strided_slice %2 {offsets = [0, 4, 0], sizes = [8, 8, 32], strides = [1, 1, 1]} : vector<8x16x32xbf16> to vector<8x8x32xbf16>
    %c128 = arith.constant 128 : index
    %c0_13 = arith.constant 0 : index
    %19 = vector.load %arg4[%c128, %c0_13] : memref<160x128xbf16, #tpu.memory_space<vmem>>, vector<32x128xbf16>
    %cst_14 = arith.constant dense<0.000000e+00> : vector<8x8x128xf32>
    %20 = tpu.matmul %18, %19, %cst_14 {dimension_numbers = #tpu.dot_dimension_numbers<[2], [0], [0, 1], [1], [0, 0, 0, 1, 1, 1], [], []>} : vector<8x8x32xbf16>, vector<32x128xbf16>, vector<8x8x128xf32> -> vector<8x8x128xf32>
    %21 = arith.addf %17, %20 : vector<8x8x128xf32>
    %c0_15 = arith.constant 0 : index
    %c0_16 = arith.constant 0 : index
    %22 = vector.load %arg5[%c0_15, %c0_16] : memref<1x128xf32, #tpu.memory_space<vmem>>, vector<1x128xf32>
    %23 = vector.shape_cast %22 : vector<1x128xf32> to vector<1x1x128xf32>
    %24 = vector.broadcast %23 : vector<1x1x128xf32> to vector<8x8x128xf32>
    %25 = arith.addf %21, %24 : vector<8x8x128xf32>
    %cst_17 = arith.constant 0.000000e+00 : f32
    %26 = vector.broadcast %cst_17 : f32 to vector<8x8x128xf32>
    %27 = arith.maximumf %25, %26 : vector<8x8x128xf32>
    %28 = tpu.iota {dimensions = array<i32: 0>} : vector<8x128xi32>
    %c8_i32 = arith.constant 8 : i32
    %29 = arith.muli %arg1, %c8_i32 : i32
    %30 = vector.broadcast %29 : i32 to vector<8x128xi32>
    %31 = arith.addi %28, %30 : vector<8x128xi32>
    %c0_18 = arith.constant 0 : index
    %c0_19 = arith.constant 0 : index
    %32 = vector.load %arg6[%c0_18, %c0_19] : memref<1x128xi32, #tpu.memory_space<vmem>>, vector<1x128xi32>
    %33 = vector.broadcast %32 : vector<1x128xi32> to vector<8x128xi32>
    %34 = arith.cmpi slt, %31, %33 : vector<8x128xi32>
    %35 = vector.shape_cast %34 : vector<8x128xi1> to vector<1x8x128xi1>
    %cst_20 = arith.constant 0.000000e+00 : f32
    %36 = vector.shape_cast %35 : vector<1x8x128xi1> to vector<1x8x128xi1>
    %37 = vector.broadcast %36 : vector<1x8x128xi1> to vector<8x8x128xi1>
    %38 = vector.broadcast %cst_20 : f32 to vector<8x8x128xf32>
    %39 = arith.select %37, %27, %38 : vector<8x8x128xi1>, vector<8x8x128xf32>
    %cst_21 = arith.constant dense<0xFF800000> : vector<8x128xf32>
    %40 = vector.multi_reduction <maximumf>, %39, %cst_21 [1] : vector<8x8x128xf32> to vector<8x128xf32>
    %c0_i32 = arith.constant 0 : i32
    %41 = arith.cmpi eq, %arg1, %c0_i32 : i32
    %42 = arith.extui %41 : i1 to i32
    %c0_i32_22 = arith.constant 0 : i32
    %43 = arith.cmpi ne, %42, %c0_i32_22 : i32
    scf.if %43 {
      %cst_27 = arith.constant 0.000000e+00 : f32
      %47 = vector.broadcast %cst_27 : f32 to vector<8x128xf32>
      %c0_28 = arith.constant 0 : index
      %c0_29 = arith.constant 0 : index
      %48 = vector.load %arg7[%c0_28, %c0_29] : memref<8x128xf32, #tpu.memory_space<vmem>>, vector<8x128xf32>
      tpu.vector_store %arg7[%c0_28, %c0_29], %47 {strides = array<i32>} : memref<8x128xf32, #tpu.memory_space<vmem>>, vector<8x128xf32>,
    } else {
    }
    %c0_23 = arith.constant 0 : index
    %c0_24 = arith.constant 0 : index
    %44 = vector.load %arg7[%c0_23, %c0_24] : memref<8x128xf32, #tpu.memory_space<vmem>>, vector<8x128xf32>
    %45 = arith.maximumf %44, %40 : vector<8x128xf32>
    %c0_25 = arith.constant 0 : index
    %c0_26 = arith.constant 0 : index
    %46 = vector.load %arg7[%c0_25, %c0_26] : memref<8x128xf32, #tpu.memory_space<vmem>>, vector<8x128xf32>
    tpu.vector_store %arg7[%c0_25, %c0_26], %45 {strides = array<i32>} : memref<8x128xf32, #tpu.memory_space<vmem>>, vector<8x128xf32>,
    return
  }
  func.func @transform_0(%arg0: i32, %arg1: i32) -> (i32, i32, i32) {
    %c0_i32 = arith.constant 0 : i32
    %c0_i32_0 = arith.constant 0 : i32
    return %arg0, %arg1, %c0_i32 : i32, i32, i32
  }
  func.func @transform_1(%arg0: i32, %arg1: i32) -> (i32, i32, i32) {
    %c1_i32 = arith.constant 1 : i32
    %0 = arith.addi %arg1, %c1_i32 : i32
    %c1_i32_0 = arith.constant 1 : i32
    %1 = arith.muli %0, %c1_i32_0 : i32
    %c0_i32 = arith.constant 0 : i32
    %c0_i32_1 = arith.constant 0 : i32
    return %arg0, %1, %c0_i32 : i32, i32, i32
  }
  func.func @transform_2(%arg0: i32, %arg1: i32) -> (i32, i32) {
    %c0_i32 = arith.constant 0 : i32
    %c0_i32_0 = arith.constant 0 : i32
    %c0_i32_1 = arith.constant 0 : i32
    return %c0_i32, %c0_i32_0 : i32, i32
  }
  func.func @transform_3(%arg0: i32, %arg1: i32) -> (i32, i32) {
    %c0_i32 = arith.constant 0 : i32
    %c0_i32_0 = arith.constant 0 : i32
    %c0_i32_1 = arith.constant 0 : i32
    return %c0_i32, %c0_i32_0 : i32, i32
  }
  func.func @transform_4(%arg0: i32, %arg1: i32) -> (i32, i32) {
    %c0_i32 = arith.constant 0 : i32
    %c0_i32_0 = arith.constant 0 : i32
    %c0_i32_1 = arith.constant 0 : i32
    return %c0_i32, %c0_i32_0 : i32, i32
  }
  func.func @transform_5(%arg0: i32, %arg1: i32) -> (i32, i32) {
    %c0_i32 = arith.constant 0 : i32
    %c0_i32_0 = arith.constant 0 : i32
    return %arg0, %c0_i32 : i32, i32
  }
}

</mosaic_0001>

<bundles_post_ra>
// kernel: tpu_custom_call.1
= control target key start
LH: loop header
LB: loop body
LE: loop exit
PB: predicated region body
PF: predicated region fallthrough
CT: control target
= control target key end

     0   :  { %s2677_s0 = inlined_call_operand.hbm [shape: bf16[16,16,32], index: 0, kind: input, shape index: {}]   ;;  %s2678_s1 = inlined_call_operand.hbm [shape: bf16[16,16,32], index: 1, kind: input, shape index: {}]   ;;  %s2679_s2 = inlined_call_operand.hbm [shape: bf16[160,128], index: 2, kind: input, shape index: {}]   ;;  %s2680_s3 = inlined_call_operand.vmem [shape: f32[1,128], index: 3, kind: input, shape index: {}]   ;;  %s2681_s4 = inlined_call_operand.vmem [shape: s32[1,128], index: 4, kind: input, shape index: {}]   ;;  %s2682_s5 = inlined_call_operand.hbm [shape: f32[16,128], index: 5, kind: output, shape index: {}]  }
   0x1   :  { %2696 = sst [smem:[#allocation17_spill]] %s2677_s0 }
   0x2   :  { %2697 = sst [smem:[#allocation18_spill]] %s2679_s2 }
   0x3   :  { %10 = vsyncpa [#allocation3], 0 }
   0x4   :  { %12 = vsyncpa [#allocation3 + $0x1], 0 }
   0x5   :  { %13 = vsyncpa [#allocation6], 0 }
   0x6   :  { %15 = vsyncpa [#allocation6 + $0x1], 0 }
   0x7   :  { %16 = vsyncpa [#allocation4], 0 }
   0x8   :  { %18 = vsyncpa [#allocation4 + $0x1], 0  ;;  %s2051_s18 = smov 0   ;;  %s2053_s19 = smov 0  }
   0x9   :  { %s2055_s20 = smov 0   ;;  %s2057_s21 = smov 0  }
   0xa   :  { %s2059_s22 = smov 0   ;;  %s2061_s23 = smov 0  }
   0xb LB: > { %2698 = sst [smem:[#allocation13_spill]] %s2000_s20  ;;  %s2082_s24 = sadd.s32 4294967295, %s2012_s23   ;;  %s2012_s23 = sphi %s2061_s23, %s24_s23   ;;  %s2008_s22 = sphi %s2059_s22, %s2743_s22   ;;  %s2004_s21 = sphi %s2057_s21, %s2742_s21   ;;  %s2000_s20 = sphi %s2055_s20, %s2738_s20   ;;  %s1996_s19 = sphi %s2053_s19, %s2741_s19   ;;  %s1992_s18 = sphi %s2051_s18, %s2740_s18  }
   0xc   : > { %s1492_s25 = sadd.s32 4294967294, %s2012_s23   ;;  %p52_p0 = scmp.ne.s32.totalorder %s2000_s20, %s1996_s19 }
   0xd   : > { %p53_p1 = scmp.eq.s32.totalorder %s2012_s23, 0  ;;  %p58_p2 = scmp.ne.s32.totalorder %s1996_s19, %s1992_s18 }
   0xe   : > { %p2683_p3 = scmp.eq.s32.totalorder %s2082_s24, 0  ;;  %p175_p4 = scmp.eq.s32.totalorder %s2082_s24, 1 }
   0xf   : > { %p2093_p5 = por %p53_p1, %p52_p0  ;;  %p181_p6 = scmp.eq.s32.totalorder %s1492_s25, 1 }
  0x10   : > { %p2099_p7 = por %p2683_p3, %p58_p2  ;;  %p2103_p8 = por %p175_p4, %p52_p0 }
  0x11   : > { %p2107_p9 = por %p181_p6, %p58_p2  ;;  %p1493_p10 = scmp.ge.s32.totalorder %s2012_s23, 1 }
  0x12   : > { %s2700_s28 = scalar_select %p2099_p7, 1, 0 }
  0x13   : > { %s2701_s29 = scalar_select %p2103_p8, 1, 0 }
  0x14   : > { %s2702_s30 = scalar_select %p2107_p9, 1, 0 }
  0x15   : > { %p188_p11 = scmp.lt.s32.totalorder %s2012_s23, 3  ;;  %s2014_s7 = smov [#allocation7]  }
  0x16   : > { %2703 = sst [smem:[#allocation14_spill]] %s2702_s30  ;;  %s200_s8 = sshll.u32 %s2014_s7, 4  ;;  %s2117_s8 = int_to_ptr.vmem [resolvable:$true] %s200_s8 }
  0x17   : > { %p2113_p12 = pnand %p1493_p10, %p188_p11  ;;  %p1759_p1 = scmp.lt.s32.totalorder %s2012_s23, 2 }
  0x18   : > { %s36_s11 = sadd.s32 1, %s2008_s22  ;;  %s2708_s2 = sld [smem:[#allocation18_spill]] }
  0x19   : > { %s2704_s6 = scalar_select %p2113_p12, 1, 0 }
  0x1a   : > { %p1743_p13 = pneg %p2113_p12  ;;  %p2131_p4 = pnand %p1759_p1, %p2093_p5 }
  0x1b   : > { %p2136_p6 = scmp.ge.s32.totalorder %s36_s11, 2 }
  0x1c   : > { %p2125_p2 = pnand %p1743_p13, %p2683_p3 }
  0x1d   : > { %s2706_s10 = scalar_select %p2131_p4, 1, 0 }
  0x1e   : > { %s2707_s12 = scalar_select %p2136_p6, 1, 0 }
  0x1f   : > { %s1833_s15 = scalar_lea.hbm %s2708_s2, 1280  ;;  %p1835_p11 = pneg %p2125_p2 }
  0x20   : > { %p1834_p10 = scmp.ne.s32.totalorder %s2708_s2, %s1833_s15  ;;  %p1840_p1 = scmp.lt.u32.totalorder %s1833_s15, %s2708_s2 }
  0x22   : > { %p1836_p13 = pnand %p1835_p11, %p1834_p10 }
  0x24   : > { %p1837_p5 = pneg %p1836_p13 }
  0x26   : > { %p1842_p0 = pnand %p1840_p1, %p1837_p5 }
  0x28   : > { %1845 = shalt.err (!%p1842_p0)
}
  0x29   : > { %s1846_s7 = scalar_lea.vmem %s2117_s8, 1280  ;;  %p1854_p7 = scmp.lt.s32.totalorder %s2117_s8, %s2117_s8 }
  0x2a   : > { %p1847_p3 = scmp.ne.s32.totalorder %s2117_s8, %s1846_s7  ;;  %p1855_p12 = scmp.lt.s32.totalorder %s1846_s7, %s1846_s7 }
  0x2c   : > { %p1849_p9 = pnand %p1847_p3, %p1835_p11  ;;  %p1856_p4 = por %p1855_p12, %p1854_p7 }
  0x2e   : > { %p1850_p8 = pneg %p1849_p9 }
  0x30   : > { %p1857_p6 = pnand %p1856_p4, %p1850_p8 }
  0x32   : > { %1860 = shalt.err (!%p1857_p6)
}
  0x33   : > { %s2689_s13 = smov 64   ;;  %s2692_s14 = smov 4  }
  0x34   : > { %1746 = dma.hbm_to_vmem [thread:$0]  (!%p2125_p2), %s2708_s2, 1280, %s2117_s8, [#allocation6], %s2689_s13, %s2689_s13, %s2692_s14  }
  0x35   : > { %s220_s17 = sand.u32 1, %s2000_s20   ;;  %p2709_p3 = scmp.ne.s32.totalorder %s2707_s12, 0 }
  0x36   : > { %s2169_s25 = sshll.u32 %s220_s17, 5  ;;  %s2691_s9 = sshll.u32 %s2008_s22, 10 }
  0x37   : > { %s2745_s11 = smov (%p2709_p3, %s36_s11), 0  ;;  %s2711_s0 = sld [smem:[#allocation17_spill]] }
  0x38   : > { %2710 = sst [smem:[#allocation15_spill]] %s2745_s11  ;;  %s40_s27 = ssub.s32 %s2008_s22, %s2745_s11 }
  0x39   : > { %p43_p7 = scmp.eq.s32.totalorder %s40_s27, 0  ;;  %s224_s8 = scalar_lea.vmem [#allocation2], %s2169_s25 }
  0x3a   : > { %s233_s12 = sshll.u32 %s224_s8, 4  ;;  %s2712_s15 = sadd.s32 1, %s2000_s20  ;;  %s2187_s12 = int_to_ptr.vmem [resolvable:$true] %s233_s12 }
  0x3b   : > { %s2185_s16 = scalar_select %p43_p7, %s2000_s20, %s2712_s15  }
  0x3c   : > { %s2189_s13 = scalar_lea.sflag [#allocation3], %s220_s17  ;;  %p2714_p9 = scmp.ne.s32.totalorder %s2706_s10, 0 }
  0x3d   : > { %s2179_s30 = scalar_lea.hbm %s2711_s0, %s2691_s9  ;;  %2713 = sst [smem:[#allocation16_spill]] %s2185_s16 }
  0x3e   : > { %s1861_s27 = scalar_lea.hbm %s2179_s30, 512  ;;  %p1863_p12 = pneg %p2714_p9 }
  0x3f   : > { %p1862_p8 = scmp.ne.s32.totalorder %s2179_s30, %s1861_s27  ;;  %s1866_s9 = scalar_lea.hbm %s2711_s0, 2048 }
  0x40   : > { %p1867_p4 = scmp.lt.u32.totalorder %s2179_s30, %s2711_s0  ;;  %p1868_p6 = scmp.lt.u32.totalorder %s1866_s9, %s1861_s27 }
  0x41   : > { %p1864_p0 = pnand %p1863_p12, %p1862_p8  ;;  %p1870_p11 = scmp.lt.u32.totalorder %s1861_s27, %s2179_s30 }
  0x42   : > { %p1869_p10 = por %p1868_p6, %p1867_p4 }
  0x43   : > { %p1865_p2 = pneg %p1864_p0 }
  0x44   : > { %p1871_p13 = por %p1870_p11, %p1869_p10 }
  0x46   : > { %p1872_p5 = pnand %p1871_p13, %p1865_p2 }
  0x48   : > { %1875 = shalt.err (!%p1872_p5)
}
  0x49   : > { %s1876_s17 = scalar_lea.vmem %s2187_s12, 512  ;;  %s2017_s15 = smov [#allocation2]  }
  0x4a   : > { %p1877_p1 = scmp.ne.s32.totalorder %s2187_s12, %s1876_s17  ;;  %s1881_s26 = sshll.u32 %s2017_s15, 4  ;;  %s1882_s26 = int_to_ptr.vmem [resolvable:$false] %s1881_s26 }
  0x4b   : > { %s1883_s14 = scalar_lea.vmem %s1882_s26, 1024  ;;  %p1884_p8 = scmp.lt.s32.totalorder %s2187_s12, %s1882_s26 }
  0x4c   : > { %p1879_p3 = pnand %p1877_p1, %p1863_p12  ;;  %p1885_p0 = scmp.lt.s32.totalorder %s1883_s14, %s1876_s17 }
  0x4e   : > { %p1880_p7 = pneg %p1879_p3  ;;  %p1886_p4 = por %p1885_p0, %p1884_p8 }
  0x50   : > { %p1887_p6 = pnand %p1886_p4, %p1880_p7 }
  0x52   : > { %1890 = shalt.err (!%p1887_p6)
}
  0x53   : > { %s2018_s9 = smov 128   ;;  %s2715_s27 = smov 4  }
  0x54   : > { %s2716_s7 = smov 64   ;;  %s2717_s8 = sshll.u32 %s2008_s22, 10 }
  0x55   : > { %1750 = dma.hbm_to_vmem [thread:$0]  (!%p2714_p9), %s2179_s30, 512, %s2187_s12, %s2189_s13, %s2018_s9, %s2716_s7, %s2715_s27  }
  0x56   : > { %s1416_s26 = scalar_lea.hbm %s2678_s1, %s2717_s8  ;;  %s247_s0 = scalar_lea.vmem [#allocation5], %s2169_s25 }
  0x57   : > { %s2225_s14 = scalar_lea.hbm %s1416_s26, 64  ;;  %s257_s2 = sshll.u32 %s247_s0, 4  ;;  %s2228_s2 = int_to_ptr.vmem [resolvable:$true] %s257_s2 }
  0x58   : > { %s243_s11 = sand.u32 1, %s2012_s23   ;;  %s1921_s20 = scalar_lea.hbm %s1416_s26, 576 }
  0x59   : > { %s2231_s16 = scalar_lea.sflag [#allocation6], %s243_s11  ;;  %p1892_p2 = scmp.ne.s32.totalorder %s2225_s14, %s1921_s20 }
  0x5a   : > { %s1896_s12 = scalar_lea.hbm %s2678_s1, 2048  ;;  %p1897_p13 = scmp.lt.u32.totalorder %s2225_s14, %s2678_s1 }
  0x5b   : > { %p1894_p10 = pnand %p1892_p2, %p1863_p12  ;;  %p1898_p5 = scmp.lt.u32.totalorder %s1896_s12, %s1921_s20 }
  0x5c   : > { %p1900_p3 = scmp.lt.u32.totalorder %s1921_s20, %s2225_s14 }
  0x5d   : > { %p1895_p11 = pneg %p1894_p10  ;;  %p1899_p1 = por %p1898_p5, %p1897_p13 }
  0x5f   : > { %p1901_p7 = por %p1900_p3, %p1899_p1 }
  0x61   : > { %p1902_p8 = pnand %p1901_p7, %p1895_p11 }
  0x63   : > { %1905 = shalt.err (!%p1902_p8)
}
  0x64   : > { %s1906_s0 = scalar_lea.vmem %s2228_s2, 512  ;;  %s2019_s11 = smov [#allocation5]  }
  0x65   : > { %p1907_p0 = scmp.ne.s32.totalorder %s2228_s2, %s1906_s0  ;;  %s1911_s25 = sshll.u32 %s2019_s11, 4  ;;  %s1912_s25 = int_to_ptr.vmem [resolvable:$false] %s1911_s25 }
  0x66   : > { %s1913_s17 = scalar_lea.vmem %s1912_s25, 1024  ;;  %p1914_p2 = scmp.lt.s32.totalorder %s2228_s2, %s1912_s25 }
  0x67   : > { %p1909_p4 = pnand %p1907_p0, %p1863_p12  ;;  %p1915_p10 = scmp.lt.s32.totalorder %s1913_s17, %s1906_s0 }
  0x69   : > { %p1910_p6 = pneg %p1909_p4  ;;  %p1916_p13 = por %p1915_p10, %p1914_p2 }
  0x6b   : > { %p1917_p5 = pnand %p1916_p13, %p1910_p6 }
  0x6d   : > { %1920 = shalt.err (!%p1917_p5)
}
  0x6e   : > { %1753 = dma.hbm_to_vmem [thread:$0]  (!%p2714_p9), %s2225_s14, 512, %s2228_s2, %s2231_s16, %s2018_s9, %s2716_s7, %s2715_s27  }
  0x6f   : > { %p2718_p12 = scmp.ne.s32.totalorder %s2704_s6, 0 }
  0x70   : > { %s2262_s20 = sand.u32 (!%p2718_p12), 1, %s1996_s19   ;;  %p2719_p11 = scmp.ne.s32.totalorder (!%p2718_p12), %s2700_s28, 0 }
  0x71   : > { %269 = sbr.rel (%p2718_p12) target bundleno = 457 (0x1c9), region = 40  ;;  %s1504_s26 = sshll.u32 (!%p2718_p12), %s2262_s20, 5 }
  0x72   : > { %s272_s30 = scalar_lea.sflag (!%p2718_p12), [#allocation3], %s2262_s20  ;;  %s2266_s13 = scalar_lea.vmem (!%p2718_p12), [#allocation2], %s1504_s26 }
  0x78   : > { %1975 = dma.done.wait (%p2719_p11), %s272_s30, 512  }
  0x79   : > { %1977 = vsyncadd (%p2719_p11), %s272_s30, 4294966784  ;;  %s280_s2 = sand.u32 1, %s2082_s24   ;;  %s2273_s10 = scalar_lea.vmem [#allocation5], %s1504_s26 }
  0x7a   : > { %s281_s6 = scalar_lea.sflag [#allocation6], %s280_s2 }
  0x7b   : > { %1979 = dma.done.wait (%p2719_p11), %s281_s6, 512  }
  0x7c   : > { %1981 = vsyncadd (%p2719_p11), %s281_s6, 4294966784  ;;  %p2720_p9 = scmp.eq.s32.totalorder %s2082_s24, 0 }
  0x7e   : > { %1983 = dma.done.wait (%p2720_p9), [#allocation6], 1280   ;;  %p2721_p1 = pmov %p2720_p9 }
  0x7f   : > { %vm751_vm0 = vcmask 1042432   ;;  %vm752_vm1 = vcmask 1046532   ;;  %v2283_v0 = vld [vmem:[#allocation7 + $0x20] sm:$0xff]   ;;  %v2289_v2 = vld [vmem:[#allocation7 + $0x28] sm:$0xff]   ;;  %v1817_v3 = vld [vmem:[#allocation7 + $0x10] sm:$0xff]   ;;  %vm364_vm3 = vcmask 1043456  }
  0x80   : > { %1985 = vsyncadd (%p2721_p1), [#allocation6], 4294966016  ;;  %1661 = vmatprep.subr.bf16.mxu0 %v2283_v0  ;;  %v324_v4 = vld [vmem:[%s2266_s13] sm:$0xf]  ;;  %v325_v5 = vld [vmem:[%s2266_s13 + $0x4] sm:$0xf]  ;;  %1637 = vmatprep.subr.bf16.mxu1 %v1817_v3 }
  0x81   : > { %vm2285_vm2 = vmor %vm751_vm0, %vm752_vm1  ;;  %1662 = vmatpush3.bf16.msra.mxu0 %v2283_v0  ;;  %v1818_v6 = vld [vmem:[%s2273_s10] ss:$0 sps:$4 sm:$0xff]   ;;  %v1819_v7 = vld [vmem:[%s2273_s10 + $0x4] ss:$0 sps:$4 sm:$0xff]   ;;  %1638 = vmatpush3.bf16.msra.mxu1 %v1817_v3  ;;  %vm437_vm4 = vsmask.f32 3328 }
  0x82   : > { %1663 = vmatprep.subr.bf16.mxu0 %v2289_v2  ;;  %v326_v8 = vld [vmem:[%s2266_s13 + $0x8] sm:$0xf]  ;;  %v327_v9 = vld [vmem:[%s2266_s13 + $0xc] sm:$0xf]  ;;  %vm438_vm5 = vsmask.f32 7440  ;;  %v2301_v10 = vsel %vm364_vm3, %v324_v4, %v1818_v6  ;;  %v2304_v11 = vsel %vm364_vm3, %v325_v5, %v1819_v7 }
  0x83   : > { %v1820_v12 = vld [vmem:[%s2273_s10 + $0x8] ss:$0 sps:$4 sm:$0xff]   ;;  %v1821_v13 = vld [vmem:[%s2273_s10 + $0xc] ss:$0 sps:$4 sm:$0xff]   ;;  %v2311_v14 = vcombine.low %v2301_v10, %v2301_v10  ;;  %v2315_v15 = vcombine.high %v2301_v10, %v2301_v10  ;;  %v2319_v16 = vcombine.low %v2304_v11, %v2304_v11  ;;  %v2323_v17 = vcombine.high %v2304_v11, %v2304_v11  ;;  %v1822_v18 = vld [vmem:[#allocation7 + $0x18] sm:$0xff]   ;;  %s1507_s27 = sshll.u32 %s2262_s20, 3 }
  0x84   : > { %vm576_vm6 = vcmask 261120   ;;  %v2326_v19 = vsel %vm364_vm3, %v326_v8, %v1820_v12  ;;  %v2329_v20 = vsel %vm364_vm3, %v327_v9, %v1821_v13  ;;  %v1823_v21 = vld [vmem:[#allocation7 + $0x30] sm:$0xff]   ;;  %1639 = vmatprep.subr.bf16.mxu1 %v1822_v18  ;;  %v2353_v31 = vld [vmem:[#allocation7] sm:$0xff]   ;;  %vm2377_vm7 = vmor %vm437_vm4, %vm438_vm5  ;;  %vm899_vm8 = vsmask.f32 2304  ;;  %s1601_s7 = sshll.u32 %s2004_s21, 7 }
  0x85   : > { %1664 = vmatpush3.bf16.msra.mxu0 %v2289_v2  ;;  %v1552_v23 = vrot.slane %v2311_v14, 9  ;;  %v756_v24 = vrot.slane %v2315_v15, 5  ;;  %v1553_v25 = vrot.slane %v2319_v16, 9  ;;  %v760_v26 = vrot.slane %v2323_v17, 5  ;;  %1640 = vmatpush3.bf16.msra.mxu1 %v1822_v18  ;;  %v1825_v57 = vld [vmem:[#allocation7 + $0x38] sm:$0xff]   ;;  %s319_s14 = scalar_lea.vmem [#allocation8], %s1507_s27  ;;  %s2628_s0 = scalar_lea.hbm %s2682_s5, %s1601_s7 }
  0x86   : > { %v2339_v27 = vcombine.low %v2326_v19, %v2326_v19  ;;  %v2343_v28 = vcombine.high %v2326_v19, %v2326_v19  ;;  %v2347_v29 = vcombine.low %v2329_v20, %v2329_v20  ;;  %v2351_v30 = vcombine.high %v2329_v20, %v2329_v20  ;;  %1673 = vmatprep.subr.bf16.mxu0 %v1823_v21  ;;  %v1599_v1 = vld [vmem:[%s2681_s4] ss:$0 sm:$0xff]  ;;  %s1376_s12 = sshll.u32 %s319_s14, 4  ;;  %s1363_s11 = scalar_lea.sflag [#allocation4], %s2262_s20  ;;  %s2630_s12 = int_to_ptr.vmem [resolvable:$true] %s1376_s12 }
  0x87   : > { %v757_v32 = vsel %vm2285_vm2, %v1552_v23, %v756_v24  ;;  %v761_v33 = vsel %vm2285_vm2, %v1553_v25, %v760_v26  ;;  %v441_v34 = vshrl.u32 %v2311_v14, 16  ;;  %v444_v35 = vshll.u32 %v2311_v14, 16  ;;  %1649 = vmatprep.subr.bf16.mxu1 %v2353_v31  ;;  %v2394_v23 = vld [vmem:[#allocation7 + $0x40] sm:$0xff]   ;;  %s1922_s25 = scalar_lea.vmem %s2630_s12, 128  ;;  %p2733_p7 = scmp.ne.s32.totalorder %s2701_s29, 0 }
  0x88   : > { %v1560_v36 = vcombine.low %v757_v32, %v761_v33  ;;  %v1554_v37 = vrot.slane %v2339_v27, 9  ;;  %v764_v38 = vrot.slane %v2343_v28, 5  ;;  %v1555_v39 = vrot.slane %v2347_v29, 9  ;;  %p1923_p3 = scmp.ne.s32.totalorder %s2630_s12, %s1922_s25  ;;  %s2020_s21 = smov [#allocation8]  }
  0x89   : > { %v768_v40 = vrot.slane %v2351_v30, 5  ;;  %v443_v41 = vrot.slane %v441_v34, 4  ;;  %v446_v42 = vrot.slane %v444_v35, 5  ;;  %v450_v43 = vshll.u32 %v2315_v15, 16  ;;  %s1926_s17 = sshll.u32 %s2020_s21, 4  ;;  %s1927_s17 = int_to_ptr.vmem [resolvable:$false] %s1926_s17 }
  0x8a   : > { %1665 = vmatprep.mubr.msk.bf16.mxu0 %vm576_vm6, %v1560_v36  ;;  %v765_v44 = vsel %vm2285_vm2, %v1554_v37, %v764_v38  ;;  %v455_v45 = vshrl.u32 %v2319_v16, 16  ;;  %v458_v46 = vshll.u32 %v2319_v16, 16  ;;  %v464_v47 = vshll.u32 %v2323_v17, 16  ;;  %p1924_p8 = pnand %p1923_p3, %p2733_p7  ;;  %s1928_s26 = scalar_lea.vmem %s1927_s17, 256 }
  0x8b   : > { %v769_v48 = vsel %vm2285_vm2, %v1555_v39, %v768_v40  ;;  %v447_v49 = vor.u32 %v446_v42, %v443_v41  ;;  %v452_v50 = vrot.slane %v450_v43, 5  ;;  %v902_v51 = vrot.slane %v441_v34, 5  ;;  %p1929_p4 = scmp.lt.s32.totalorder %s2630_s12, %s1927_s17  ;;  %p1930_p6 = scmp.lt.s32.totalorder %s1928_s26, %s1922_s25 }
  0x8c   : > { %v1561_v52 = vcombine.low %v765_v44, %v769_v48  ;;  %v457_v54 = vrot.slane %v455_v45, 4  ;;  %v460_v55 = vrot.slane %v458_v46, 5  ;;  %v466_v56 = vrot.slane %v464_v47, 5  ;;  %v1826_v44 = vld [vmem:[%s2273_s10 + $0x10] ss:$0 sps:$4 sm:$0xff]   ;;  %p1925_p0 = pneg %p1924_p8 }
  0x8d   : > { %v448_v58 = vrot.slane %v447_v49, 4  ;;  %v903_v59 = vrot.slane %v444_v35, 6  ;;  %v2381_v60 = vrot.slane %v450_v43, 6  ;;  %v912_v61 = vrot.slane %v455_v45, 5  ;;  %v1827_v45 = vld [vmem:[%s2273_s10 + $0x14] ss:$0 sps:$4 sm:$0xff]   ;;  %p1931_p2 = por %p1930_p6, %p1929_p4 }
  0x8e   : > { %vm900_vm9 = vsmask.f32 6416  ;;  %1666 = vmatmul.mubr.msk.bf16.vlgmr.msra.gmra.mrb[0].mxu0 %vm576_vm6, %v1561_v52  ;;  %v461_v62 = vor.u32 %v460_v55, %v457_v54  ;;  %v913_v63 = vrot.slane %v458_v46, 6  ;;  %v2384_v3 = vrot.slane %v464_v47, 6 }
  0x8f   : > { %v469_v4 = vshrl.u32 %v2339_v27, 16  ;;  %v453_v5 = vsel %vm2377_vm7, %v448_v58, %v452_v50  ;;  %1674 = vmatpush3.bf16.msra.mxu0 %v1823_v21  ;;  %v472_v6 = vshll.u32 %v2339_v27, 16  ;;  %v478_v7 = vshll.u32 %v2343_v28, 16  ;;  %v328_v50 = vld [vmem:[%s2266_s13 + $0x10] sm:$0xf]  ;;  %vm2413_vm10 = vmor %vm899_vm8, %vm900_vm9  ;;  %p1932_p10 = pnand %p1931_p2, %p1925_p0 }
  0x90   : > { %v483_v8 = vshrl.u32 %v2347_v29, 16  ;;  %v462_v9 = vrot.slane %v461_v62, 4  ;;  %v486_v13 = vshll.u32 %v2347_v29, 16  ;;  %v492_v18 = vshll.u32 %v2351_v30, 16  ;;  %1675 = vmatprep.subr.bf16.mxu0 %v1825_v57  ;;  %v329_v62 = vld [vmem:[%s2266_s13 + $0x14] sm:$0xf] }
  0x91   : > { %v471_v12 = vrot.slane %v469_v4, 4  ;;  %v474_v24 = vrot.slane %v472_v6, 5  ;;  %v480_v25 = vrot.slane %v478_v7, 5  ;;  %v922_v21 = vrot.slane %v469_v4, 5 }
  0x92   : > { %v485_v26 = vrot.slane %v483_v8, 4  ;;  %v467_v32 = vsel %vm2377_vm7, %v462_v9, %v466_v56  ;;  %v488_v33 = vrot.slane %v486_v13, 5  ;;  %v494_v34 = vrot.slane %v492_v18, 5 }
  0x93   : > { %v923_v35 = vrot.slane %v472_v6, 6  ;;  %v1532_v36 = vcombine.low %v453_v5, %v467_v32  ;;  %v475_v37 = vor.u32 %v474_v24, %v471_v12  ;;  %v929_v38 = vrot.slane %v478_v7, 6  ;;  %1676 = vmatpush3.bf16.msra.mxu0 %v1825_v57 }
  0x94   : > { %v932_v39 = vrot.slane %v483_v8, 5  ;;  %v489_v40 = vor.u32 %v488_v33, %v485_v26  ;;  %v933_v41 = vrot.slane %v486_v13, 6  ;;  %v939_v42 = vrot.slane %v492_v18, 6  ;;  %1685 = vmatprep.subr.bf16.mxu0 %v2394_v23  ;;  %v1828_v13 = vld [vmem:[#allocation7 + $0x8] sm:$0xff]  }
  0x95   : > { %v904_v43 = vor.u32 %v903_v59, %v902_v51  ;;  %1641 = vmatprep.mubr.msk.bf16.mxu1 %vm576_vm6, %v1532_v36  ;;  %v476_v46 = vrot.slane %v475_v37, 4  ;;  %v906_v47 = vshrl.u32 %v2315_v15, 16  ;;  %v914_v48 = vor.u32 %v913_v63, %v912_v61 }
  0x96   : > { %v916_v49 = vshrl.u32 %v2323_v17, 16  ;;  %v490_v52 = vrot.slane %v489_v40, 4  ;;  %v924_v55 = vor.u32 %v923_v35, %v922_v21  ;;  %v926_v56 = vshrl.u32 %v2343_v28, 16  ;;  %v1829_v21 = vld [vmem:[%s2273_s10 + $0x18] ss:$0 sps:$4 sm:$0xff]  }
  0x97   : > { %v905_v54 = vrot.slane %v904_v43, 4  ;;  %v481_v51 = vsel %vm2377_vm7, %v476_v46, %v480_v25  ;;  %v908_v57 = vrot.slane %v906_v47, 5  ;;  %v915_v58 = vrot.slane %v914_v48, 4  ;;  %v1830_v43 = vld [vmem:[%s2273_s10 + $0x1c] ss:$0 sps:$4 sm:$0xff]  }
  0x98   : > { %v918_v59 = vrot.slane %v916_v49, 5  ;;  %v495_v4 = vsel %vm2377_vm7, %v490_v52, %v494_v34  ;;  %v925_v63 = vrot.slane %v924_v55, 4  ;;  %v928_v5 = vrot.slane %v926_v56, 5  ;;  %v330_v34 = vld [vmem:[%s2266_s13 + $0x18] sm:$0xf] }
  0x99   : > { %v934_v6 = vor.u32 %v933_v41, %v932_v39  ;;  %v1533_v7 = vcombine.low %v481_v51, %v495_v4  ;;  %v910_v8 = vor.u32 %v2381_v60, %v908_v57  ;;  %v936_v12 = vshrl.u32 %v2351_v30, 16  ;;  %v331_v47 = vld [vmem:[%s2266_s13 + $0x1c] sm:$0xf]  ;;  %v1832_v57 = vld [vmem:[#allocation7 + $0x48] sm:$0xff]  }
  0x9a   : > { %v920_v9 = vor.u32 %v2384_v3, %v918_v59  ;;  %v930_v18 = vor.u32 %v929_v38, %v928_v5  ;;  %v2421_v25 = vsel %vm364_vm3, %v328_v50, %v1826_v44  ;;  %v2424_v26 = vsel %vm364_vm3, %v329_v62, %v1827_v45 }
  0x9b   : > { %v935_v24 = vrot.slane %v934_v6, 4  ;;  %1642 = vmatmul.mubr.msk.bf16.vlgmr.msra.gmra.mrb[0].mxu1 %vm576_vm6, %v1533_v7  ;;  %v911_v60 = vsel %vm2413_vm10, %v905_v54, %v910_v8  ;;  %v938_v32 = vrot.slane %v936_v12, 5  ;;  %v2434_v33 = vcombine.low %v2421_v25, %v2421_v25 }
  0x9c   : > { %v921_v3 = vsel %vm2413_vm10, %v915_v58, %v920_v9  ;;  %1650 = vmatpush3.bf16.msra.mxu1 %v2353_v31  ;;  %v931_v36 = vsel %vm2413_vm10, %v925_v63, %v930_v18  ;;  %v2442_v37 = vcombine.high %v2421_v25, %v2421_v25  ;;  %v2446_v38 = vcombine.low %v2424_v26, %v2424_v26 }
  0x9d   : > { %v1570_v35 = vcombine.low %v911_v60, %v921_v3  ;;  %v940_v39 = vor.u32 %v939_v42, %v938_v32  ;;  %v2450_v40 = vcombine.high %v2424_v26, %v2424_v26  ;;  %v497_v41 = vshrl.u32 %v2434_v33, 16  ;;  %1651 = vmatprep.subr.bf16.mxu1 %v1828_v13 }
  0x9e   : > { %v500_v31 = vshll.u32 %v2434_v33, 16  ;;  %v506_v44 = vshll.u32 %v2442_v37, 16  ;;  %v511_v45 = vshrl.u32 %v2446_v38, 16  ;;  %v514_v46 = vshll.u32 %v2446_v38, 16 }
  0x9f   : > { %1677 = vmatprep.mubr.msk.bf16.mxu0 %vm576_vm6, %v1570_v35  ;;  %v2461_v42 = vsel %vm364_vm3, %v330_v34, %v1829_v21  ;;  %v941_v48 = vsel %vm2413_vm10, %v935_v24, %v940_v39  ;;  %v499_v49 = vrot.slane %v497_v41, 4  ;;  %v520_v52 = vshll.u32 %v2450_v40, 16 }
  0xa0   : > { %v502_v50 = vrot.slane %v500_v31, 5  ;;  %v1571_v54 = vcombine.low %v931_v36, %v941_v48  ;;  %v508_v55 = vrot.slane %v506_v44, 5  ;;  %v513_v56 = vrot.slane %v511_v45, 4  ;;  %1652 = vmatpush3.bf16.msra.mxu1 %v1828_v13 }
  0xa1   : > { %v516_v51 = vrot.slane %v514_v46, 5  ;;  %v522_v59 = vrot.slane %v520_v52, 5  ;;  %v2467_v62 = vsel %vm364_vm3, %v331_v47, %v1830_v43  ;;  %v2471_v4 = vcombine.low %v2461_v42, %v2461_v42  ;;  %1697 = vmatprep.subr.bf16.mxu1 %v2283_v0 }
  0xa2   : > { %v503_v58 = vor.u32 %v502_v50, %v499_v49  ;;  %1678 = vmatmul.mubr.msk.bf16.vlgmr.msra.gmra.mrb[0].mxu0 %vm576_vm6, %v1571_v54  ;;  %v2477_v5 = vcombine.high %v2461_v42, %v2461_v42  ;;  %v2481_v6 = vcombine.low %v2467_v62, %v2467_v62  ;;  %v2485_v7 = vcombine.high %v2467_v62, %v2467_v62 }
  0xa3   : > { %v517_v63 = vor.u32 %v516_v51, %v513_v56  ;;  %v525_v9 = vshrl.u32 %v2471_v4, 16  ;;  %v528_v12 = vshll.u32 %v2471_v4, 16  ;;  %1686 = vmatpush3.bf16.msra.mxu0 %v2394_v23  ;;  %v942_v13 = vrot.slane %v497_v41, 5 }
  0xa4   : > { %v504_v8 = vrot.slane %v503_v58, 4  ;;  %v534_v24 = vshll.u32 %v2477_v5, 16  ;;  %v539_v21 = vshrl.u32 %v2481_v6, 16  ;;  %v542_v60 = vshll.u32 %v2481_v6, 16  ;;  %1687 = vmatprep.subr.bf16.mxu0 %v1832_v57 }
  0xa5   : > { %v518_v18 = vrot.slane %v517_v63, 4  ;;  %v527_v32 = vrot.slane %v525_v9, 4  ;;  %v530_v34 = vrot.slane %v528_v12, 5  ;;  %v548_v35 = vshll.u32 %v2485_v7, 16 }
  0xa6   : > { %v509_v3 = vsel %vm2377_vm7, %v504_v8, %v508_v55  ;;  %vm1095_vm11 = vcmask 1041408   ;;  %vm1096_vm12 = vcmask 1045508   ;;  %v536_v36 = vrot.slane %v534_v24, 5 }
  0xa7   : > { %v523_v23 = vsel %vm2377_vm7, %v518_v18, %v522_v59  ;;  %v541_v39 = vrot.slane %v539_v21, 4  ;;  %v544_v41 = vrot.slane %v542_v60, 5  ;;  %v531_v47 = vor.u32 %v530_v34, %v527_v32  ;;  %1688 = vmatpush3.bf16.msra.mxu0 %v1832_v57  ;;  %vm2518_vm13 = vmor %vm1095_vm11, %vm1096_vm12 }
  0xa8   : > { %v1534_v43 = vcombine.low %v509_v3, %v523_v23  ;;  %v550_v48 = vrot.slane %v548_v35, 5  ;;  %v943_v49 = vrot.slane %v500_v31, 6  ;;  %v946_v54 = vshrl.u32 %v2442_v37, 16 }
  0xa9   : > { %v545_v50 = vor.u32 %v544_v41, %v541_v39  ;;  %v949_v55 = vrot.slane %v506_v44, 6  ;;  %v952_v56 = vrot.slane %v511_v45, 5  ;;  %v532_v51 = vrot.slane %v531_v47, 4 }
  0xaa   : > { %1645 = vmatprep.mubr.msk.bf16.mxu1 %vm576_vm6, %v1534_v43  ;;  %v944_v58 = vor.u32 %v943_v49, %v942_v13  ;;  %v953_v63 = vrot.slane %v514_v46, 6  ;;  %v956_v59 = vshrl.u32 %v2450_v40, 16  ;;  %v948_v18 = vrot.slane %v946_v54, 5 }
  0xab   : > { %v546_v8 = vrot.slane %v545_v50, 4  ;;  %v959_v22 = vrot.slane %v520_v52, 6  ;;  %v962_v3 = vrot.slane %v525_v9, 5  ;;  %v537_v31 = vsel %vm2377_vm7, %v532_v51, %v536_v36 }
  0xac   : > { %v945_v57 = vrot.slane %v944_v58, 4  ;;  %v954_v32 = vor.u32 %v953_v63, %v952_v56  ;;  %v958_v34 = vrot.slane %v956_v59, 5  ;;  %v950_v45 = vor.u32 %v949_v55, %v948_v18 }
  0xad   : > { %v551_v44 = vsel %vm2377_vm7, %v546_v8, %v550_v48  ;;  %v963_v23 = vrot.slane %v528_v12, 6  ;;  %v966_v13 = vshrl.u32 %v2477_v5, 16  ;;  %v969_v43 = vrot.slane %v534_v24, 6 }
  0xae   : > { %v1535_v46 = vcombine.low %v537_v31, %v551_v44  ;;  %v955_v39 = vrot.slane %v954_v32, 4  ;;  %v960_v41 = vor.u32 %v959_v22, %v958_v34  ;;  %v951_v52 = vsel %vm2413_vm10, %v945_v57, %v950_v45 }
  0xaf   : > { %v964_v9 = vor.u32 %v963_v23, %v962_v3  ;;  %v968_v47 = vrot.slane %v966_v13, 5  ;;  %v972_v36 = vrot.slane %v539_v21, 5  ;;  %v973_v48 = vrot.slane %v542_v60, 6 }
  0xb0   : > { %1646 = vmatmul.mubr.msk.bf16.gmra.mrb[4].mxu1 %vm576_vm6, %v1535_v46  ;;  %v961_v53 = vsel %vm2413_vm10, %v955_v39, %v960_v41  ;;  %v976_v12 = vshrl.u32 %v2485_v7, 16  ;;  %v979_v49 = vrot.slane %v548_v35, 6  ;;  %v2728_v22 = vcombine.low %v2301_v10, %v2304_v11 }
  0xb1   : > { %v1572_v50 = vcombine.low %v951_v52, %v961_v53  ;;  %v965_v54 = vrot.slane %v964_v9, 4  ;;  %v970_v55 = vor.u32 %v969_v43, %v968_v47  ;;  %v974_v21 = vor.u32 %v973_v48, %v972_v36 }
  0xb2   : > { %1653 = vmatprep.mubr.msk.bf16.mxu1 %vm576_vm6, %v2728_v22  ;;  %v978_v56 = vrot.slane %v976_v12, 5  ;;  %v1580_v60 = vrot.slane %v2311_v14, 10  ;;  %v1100_v35 = vrot.slane %v2315_v15, 6  ;;  %v1543_v51 = vcombine.low %v2326_v19, %v2329_v20 }
  0xb3   : > { %1681 = vmatprep.mubr.msk.bf16.mxu0 %vm576_vm6, %v1572_v50  ;;  %v1581_v10 = vrot.slane %v2319_v16, 10  ;;  %v1104_v11 = vrot.slane %v2323_v17, 6  ;;  %v971_v58 = vsel %vm2413_vm10, %v965_v54, %v970_v55  ;;  %v975_v63 = vrot.slane %v974_v21, 4  ;;  %v1598_v50 = vld [vmem:[%s2680_s3] ss:$0 sm:$0xff] }
  0xb4   : > { %v980_v59 = vor.u32 %v979_v49, %v978_v56  ;;  %v1101_v8 = vsel %vm2518_vm13, %v1580_v60, %v1100_v35  ;;  %v1582_v15 = vrot.slane %v2339_v27, 10  ;;  %v1108_v18 = vrot.slane %v2343_v28, 6 }
  0xb5   : > { %v1105_v14 = vsel %vm2518_vm13, %v1581_v10, %v1104_v11  ;;  %v1583_v19 = vrot.slane %v2347_v29, 10  ;;  %v1112_v20 = vrot.slane %v2351_v30, 6  ;;  %v1544_v3 = vcombine.low %v2421_v25, %v2424_v26 }
  0xb6   : > { %v981_v16 = vsel %vm2413_vm10, %v975_v63, %v980_v59  ;;  %v1588_v17 = vcombine.low %v1101_v8, %v1105_v14  ;;  %v1584_v57 = vrot.slane %v2434_v33, 10  ;;  %v1116_v32 = vrot.slane %v2442_v37, 6 }
  0xb7   : > { %v1573_v31 = vcombine.low %v971_v58, %v981_v16  ;;  %v1585_v27 = vrot.slane %v2446_v38, 10  ;;  %v1120_v28 = vrot.slane %v2450_v40, 6  ;;  %v1109_v29 = vsel %vm2518_vm13, %v1582_v15, %v1108_v18 }
  0xb8   : > { %1654 = vmatmul.mubr.msk.bf16.vlgmr.msra.gmra.mrb[0].mxu1 %vm576_vm6, %v1543_v51  ;;  %v1113_v30 = vsel %vm2518_vm13, %v1583_v19, %v1112_v20  ;;  %v1556_v61 = vrot.slane %v2434_v33, 9  ;;  %v772_v25 = vrot.slane %v2442_v37, 5  ;;  %v1557_v26 = vrot.slane %v2446_v38, 9 }
  0xb9   : > { %1682 = vmatmul.mubr.msk.bf16.gmra.mrb[4].mxu0 %vm576_vm6, %v1573_v31  ;;  %1699 = vmatpush3.bf16.msra.mxu1 %v2283_v0  ;;  %v1117_v0 = vsel %vm2518_vm13, %v1584_v57, %v1116_v32  ;;  %v1121_v34 = vsel %vm2518_vm13, %v1585_v27, %v1120_v28  ;;  %v776_v44 = vrot.slane %v2450_v40, 5  ;;  %v1545_v45 = vcombine.low %v2461_v42, %v2467_v62 }
  0xba   : > { %1689 = vmatprep.mubr.msk.bf16.mxu0 %vm576_vm6, %v1588_v17  ;;  %1657 = vmatprep.mubr.msk.bf16.mxu1 %vm576_vm6, %v1544_v3  ;;  %v773_v33 = vsel %vm2285_vm2, %v1556_v61, %v772_v25  ;;  %v1589_v23 = vcombine.low %v1109_v29, %v1113_v30  ;;  %v1586_v37 = vrot.slane %v2471_v4, 10  ;;  %v1124_v38 = vrot.slane %v2477_v5, 6 }
  0xbb   : > { %1698 = vmatprep.subr.bf16.mxu1 %v2289_v2  ;;  %v777_v13 = vsel %vm2285_vm2, %v1557_v26, %v776_v44  ;;  %v1590_v46 = vcombine.low %v1117_v0, %v1121_v34  ;;  %v1587_v39 = vrot.slane %v2481_v6, 10  ;;  %v1128_v40 = vrot.slane %v2485_v7, 6 }
  0xbc   : > { %v1562_v41 = vcombine.low %v773_v33, %v777_v13  ;;  %v780_v42 = vrot.slane %v2477_v5, 5  ;;  %v1559_v62 = vrot.slane %v2481_v6, 9  ;;  %v784_v43 = vrot.slane %v2485_v7, 5 }
  0xbd   : > { %1700 = vmatpush3.bf16.msra.mxu1 %v2289_v2  ;;  %v1558_v2 = vrot.slane %v2471_v4, 9  ;;  %v1125_v52 = vsel %vm2518_vm13, %v1586_v37, %v1124_v38  ;;  %v1129_v9 = vsel %vm2518_vm13, %v1587_v39, %v1128_v40  ;;  %v1262_v12 = vlaneseq }
  0xbe   : > { %v1591_v47 = vcombine.low %v1125_v52, %v1129_v9  ;;  %v785_v4 = vsel %vm2285_vm2, %v1559_v62, %v784_v43  ;;  %vm1345_vm15 = vcmask 1041409   ;;  %vm1347_vm0 = vcmask 1042434  }
  0xbf   : > { %v781_v36 = vsel %vm2285_vm2, %v1558_v2, %v780_v42  ;;  %v1263_v54 = vshrl.u32 %v1262_v12, 7  ;;  %vm1349_vm1 = vcmask 1043459   ;;  %vm1351_vm2 = vcmask 1044484  }
  0xc0   : > { %1658 = vmatmul.mubr.msk.bf16.gmra.mrb[4].mxu1 %vm576_vm6, %v1545_v45  ;;  %v1563_v5 = vcombine.low %v781_v36, %v785_v4  ;;  %vm1353_vm3 = vcmask 1045509   ;;  %vm1355_vm4 = vcmask 1046534   ;;  %vm1357_vm5 = vcmask 1047559  }
  0xc1   : > { %1690 = vmatmul.mubr.msk.bf16.vlgmr.msra.gmra.mrb[0].mxu0 %vm576_vm6, %v1589_v23  ;;  %1669 = vmatprep.mubr.msk.bf16.mxu1 %vm576_vm6, %v1562_v41  ;;  %vm2600_vm14 = vcmp.lt.s32.totalorder %v1263_v54, %v1599_v1 }
  0xc2   : > { %1693 = vmatprep.mubr.msk.bf16.mxu0 %vm576_vm6, %v1590_v46 }
  0xc9   : > { %1694 = vmatmul.mubr.msk.bf16.gmra.mrb[4].mxu0 %vm576_vm6, %v1591_v47 }
  0xcc   : > { %1670 = vmatmul.mubr.msk.bf16.vlgmr.msra.gmra.mrb[4].mxu1 %vm576_vm6, %v1563_v5 }
 0x18b   : > { %v1655_v6 = vpop.f32.mrb[0].mxu1 }
 0x18c   : > { %v716_v7 = vpop.f32.mrb[1].mxu1 }
 0x18d   : > { %v1656_v53 = vpop.f32.mrb[2].mxu1 }
 0x18e   : > { %v719_v48 = vpop.f32.mrb[3].mxu1 }
 0x194   : > { %v1691_v49 = vpop.f32.mrb[0].mxu0 }
 0x195   : > { %v1701_v55 = vadd.f32 %v1691_v49, %v1655_v6  ;;  %v1200_v22 = vpop.f32.mrb[1].mxu0 }
 0x196   : > { %v1702_v24 = vadd.f32 %v1200_v22, %v716_v7  ;;  %v1692_v21 = vpop.f32.mrb[2].mxu0 }
 0x197   : > { %v1248_v56 = vadd.f32 %v1701_v55, %v1598_v50  ;;  %v1703_v60 = vadd.f32 %v1692_v21, %v1656_v53  ;;  %v1203_v35 = vpop.f32.mrb[3].mxu0 }
 0x198   : > { %v1246_v10 = vadd.f32 %v1702_v24, %v1598_v50  ;;  %v1704_v11 = vadd.f32 %v1203_v35, %v719_v48 }
 0x199   : > { %v1256_v58 = vmax.f32 %v1248_v56, 0.0  ;;  %v1249_v63 = vadd.f32 %v1703_v60, %v1598_v50 }
 0x19a   : > { %v1254_v59 = vmax.f32 %v1246_v10, 0.0  ;;  %v1247_v8 = vadd.f32 %v1704_v11, %v1598_v50 }
 0x19b   : > { %v1277_v14 = vsel %vm2600_vm14, %v1256_v58, 0.0  ;;  %v1257_v15 = vmax.f32 %v1249_v63, 0.0 }
 0x19c   : > { %v1295_v18 = vrot.slane %v1277_v14, 4  ;;  %v1275_v19 = vsel %vm2600_vm14, %v1254_v59, 0.0  ;;  %v1255_v16 = vmax.f32 %v1247_v8, 0.0  ;;  %v1695_v17 = vpop.f32.mrb[4].mxu0 }
 0x19d   : > { %v1283_v20 = vrot.slane %v1275_v19, 4  ;;  %v1278_v3 = vsel %vm2600_vm14, %v1257_v15, 0.0  ;;  %v1216_v31 = vpop.f32.mrb[5].mxu0 }
 0x19e   : > { %v1296_v57 = vmax.f32 %v1277_v14, %v1295_v18  ;;  %v1301_v32 = vrot.slane %v1278_v3, 4  ;;  %v1276_v27 = vsel %vm2600_vm14, %v1255_v16, 0.0  ;;  %v1696_v28 = vpop.f32.mrb[6].mxu0 }
 0x19f   : > { %v1284_v29 = vmax.f32 %v1275_v19, %v1283_v20  ;;  %v1289_v30 = vrot.slane %v1276_v27, 4  ;;  %v1219_v61 = vpop.f32.mrb[7].mxu0  ;;  %v1671_v25 = vpop.f32.mrb[4].mxu1 }
 0x1a0   : > { %v1297_v26 = vrot.slane %v1296_v57, 2  ;;  %v1302_v0 = vmax.f32 %v1278_v3, %v1301_v32  ;;  %v1705_v34 = vadd.f32 %v1695_v17, %v1671_v25  ;;  %v872_v44 = vpop.f32.mrb[5].mxu1 }
 0x1a1   : > { %v1285_v45 = vrot.slane %v1284_v29, 2  ;;  %v1290_v33 = vmax.f32 %v1276_v27, %v1289_v30  ;;  %v1706_v23 = vadd.f32 %v1216_v31, %v872_v44  ;;  %v1672_v37 = vpop.f32.mrb[6].mxu1 }
 0x1a2   : > { %v1298_v38 = vmax.f32 %v1296_v57, %v1297_v26  ;;  %v1303_v13 = vrot.slane %v1302_v0, 2  ;;  %v1252_v46 = vadd.f32 %v1705_v34, %v1598_v50  ;;  %v1707_v39 = vadd.f32 %v1696_v28, %v1672_v37  ;;  %v875_v40 = vpop.f32.mrb[7].mxu1 }
 0x1a3   : > { %v1286_v41 = vmax.f32 %v1284_v29, %v1285_v45  ;;  %v1291_v2 = vrot.slane %v1290_v33, 2  ;;  %v1250_v42 = vadd.f32 %v1706_v23, %v1598_v50  ;;  %v1708_v62 = vadd.f32 %v1219_v61, %v875_v40 }
 0x1a4   : > { %v1304_v43 = vmax.f32 %v1302_v0, %v1303_v13  ;;  %v1260_v52 = vmax.f32 %v1252_v46, 0.0  ;;  %v1253_v9 = vadd.f32 %v1707_v39, %v1598_v50  ;;  %v1299_v6 = vrot.slane %v1298_v38, 1 }
 0x1a5   : > { %v1287_v47 = vrot.slane %v1286_v41, 1  ;;  %v1292_v36 = vmax.f32 %v1290_v33, %v1291_v2  ;;  %v1258_v4 = vmax.f32 %v1250_v42, 0.0  ;;  %v1251_v5 = vadd.f32 %v1708_v62, %v1598_v50 }
 0x1a6   : > { %v1305_v7 = vrot.slane %v1304_v43, 1  ;;  %v1281_v53 = vsel %vm2600_vm14, %v1260_v52, 0.0  ;;  %v1261_v48 = vmax.f32 %v1253_v9, 0.0  ;;  %v1300_v60 = vmax.f32 %v1298_v38, %v1299_v6 }
 0x1a7   : > { %v1293_v12 = vrot.slane %v1292_v36, 1  ;;  %v1319_v49 = vrot.slane %v1281_v53, 4  ;;  %v1279_v54 = vsel %vm2600_vm14, %v1258_v4, 0.0  ;;  %v1259_v22 = vmax.f32 %v1251_v5, 0.0 }
 0x1a8   : > { %v1307_v55 = vrot.slane %v1279_v54, 4  ;;  %v1282_v1 = vsel %vm2600_vm14, %v1261_v48, 0.0  ;;  %v1288_v24 = vmax.f32 %v1286_v41, %v1287_v47  ;;  %v1306_v35 = vmax.f32 %v1304_v43, %v1305_v7 }
 0x1a9   : > { %v1294_v50 = vmax.f32 %v1292_v36, %v1293_v12  ;;  %v1320_v21 = vmax.f32 %v1281_v53, %v1319_v49  ;;  %v1325_v56 = vrot.slane %v1282_v1, 4  ;;  %v1280_v11 = vsel %vm2600_vm14, %v1259_v22, 0.0 }
 0x1aa   : > { %v1308_v10 = vmax.f32 %v1279_v54, %v1307_v55  ;;  %v1313_v8 = vrot.slane %v1280_v11, 4 }
 0x1ab   : > { %v1346_v58 = vsel %vm1345_vm15, %v1294_v50, %v1288_v24  ;;  %v1321_v63 = vrot.slane %v1320_v21, 2  ;;  %v1326_v59 = vmax.f32 %v1282_v1, %v1325_v56 }
 0x1ac   : > { %v1348_v14 = vsel %vm1347_vm0, %v1300_v60, %v1346_v58  ;;  %v1309_v15 = vrot.slane %v1308_v10, 2  ;;  %v1314_v16 = vmax.f32 %v1280_v11, %v1313_v8 }
 0x1ad   : > { %v1350_v18 = vsel %vm1349_vm1, %v1306_v35, %v1348_v14  ;;  %v1327_v19 = vrot.slane %v1326_v59, 2  ;;  %v1322_v17 = vmax.f32 %v1320_v21, %v1321_v63 }
 0x1ae   : > { %v1310_v20 = vmax.f32 %v1308_v10, %v1309_v15  ;;  %v1315_v31 = vrot.slane %v1314_v16, 2 }
 0x1af   : > { %v1328_v3 = vmax.f32 %v1326_v59, %v1327_v19  ;;  %v1323_v32 = vrot.slane %v1322_v17, 1 }
 0x1b0   : > { %v1311_v57 = vrot.slane %v1310_v20, 1  ;;  %v1316_v51 = vmax.f32 %v1314_v16, %v1315_v31 }
 0x1b1   : > { %v1329_v28 = vrot.slane %v1328_v3, 1  ;;  %v1324_v25 = vmax.f32 %v1322_v17, %v1323_v32 }
 0x1b2   : > { %v1312_v27 = vmax.f32 %v1310_v20, %v1311_v57  ;;  %v1317_v29 = vrot.slane %v1316_v51, 1 }
 0x1b3   : > { %v1330_v26 = vmax.f32 %v1328_v3, %v1329_v28 }
 0x1b4   : > { %v1352_v30 = vsel %vm1351_vm2, %v1312_v27, %v1350_v18  ;;  %v1318_v61 = vmax.f32 %v1316_v51, %v1317_v29 }
 0x1b6   : > { %v1354_v0 = vsel %vm1353_vm3, %v1318_v61, %v1352_v30 }
 0x1b7   : > { %v1356_v34 = vsel %vm1355_vm4, %v1324_v25, %v1354_v0 }
 0x1b8   : > { %v1358_v44 = vsel %vm1357_vm5, %v1330_v26, %v1356_v34 }
 0x1b9   : > { %v1360_v45 = vmax.f32 %v1358_v44, 0.0 }
 0x1bb   : > { %1361 = vst [vmem:[%s319_s14] sm:$0xff] %v1360_v45 }
 0x1bc   : > { %1935 = shalt.err (!%p1932_p10)
}
 0x1bd   : > { %s1936_s20 = scalar_lea.hbm %s2628_s0, 128  ;;  %s1940_s2 = scalar_lea.hbm %s2682_s5, 256 }
 0x1be   : > { %p1937_p13 = scmp.ne.s32.totalorder %s2628_s0, %s1936_s20  ;;  %p1941_p11 = scmp.lt.u32.totalorder %s2628_s0, %s2682_s5 }
 0x1bf   : > { %p1942_p9 = scmp.lt.u32.totalorder %s1940_s2, %s1936_s20  ;;  %p1944_p3 = scmp.lt.u32.totalorder %s1936_s20, %s2628_s0 }
 0x1c0   : > { %p1938_p5 = pnand %p1937_p13, %p2733_p7 }
 0x1c1   : > { %p1943_p1 = por %p1942_p9, %p1941_p11 }
 0x1c2   : > { %p1939_p12 = pneg %p1938_p5 }
 0x1c3   : > { %p1945_p8 = por %p1944_p3, %p1943_p1 }
 0x1c5   : > { %p1946_p0 = pnand %p1945_p8, %p1939_p12 }
 0x1c7   : > { %1949 = shalt.err (!%p1946_p0)
}
 0x1c8   : > { %1741 = dma.vmem_to_hbm [thread:$0]  (%p2733_p7), %s2630_s12, 128, %s2628_s0, %s1363_s11  }
 0x1c9 PF: > { %s2734_s24 = sld [smem:[#allocation14_spill]]  ;;  %s1388_s28 = sand.u32 1, %s1992_s18  }
 0x1ca   : > { %p2736_p6 = scmp.ge.s32.totalorder %s2012_s23, 2  ;;  %s1389_s16 = scalar_lea.sflag [#allocation4], %s1388_s28 }
 0x1cf   : > { %p2735_p4 = scmp.ne.s32.totalorder %s2734_s24, 0 }
 0x1d1   : > { %p1755_p2 = pnand %p2736_p6, %p2735_p4 }
 0x1d3   : > { %1987 = dma.done.wait (!%p1755_p2), %s1389_s16, 128  }
 0x1d4   : > { %1989 = vsyncadd (!%p1755_p2), %s1389_s16, 4294967168  ;;  %s24_s23 = sadd.s32 1, %s2012_s23   ;;  %s2737_s9 = sld [smem:[#allocation13_spill]] }
 0x1d5   : > { %p21_p10 = scmp.ge.s32.totalorder %s24_s23, 4   ;;  %s2738_s20 = sld [smem:[#allocation16_spill]] }
 0x1d6   : > { %s2739_s29 = sld [smem:[#allocation15_spill]]  ;;  %s2740_s18 = smov %s1996_s19 }
 0x1d7   : > { %s2742_s21 = smov %s2008_s22  ;;  %23 = sbr.rel (!%p21_p10) target bundleno = 11 (0xb), region = 106 }
 0x1da   : > { %s2741_s19 = smov %s2737_s9 }
 0x1dc   : > { %s2743_s22 = smov %s2739_s29 }
 0x1de   :  { %1394 = vsyncpa [#allocation3], 1 }
 0x1df   :  { %1396 = vsyncpa [#allocation3 + $0x1], 1 }
 0x1e0   :  { %1397 = vsyncpa [#allocation6], 1 }
 0x1e1   :  { %1399 = vsyncpa [#allocation6 + $0x1], 1 }
 0x1e2   :  { %1400 = vsyncpa [#allocation4], 1 }
 0x1e3   :  { %1402 = vsyncpa [#allocation4 + $0x1], 1 }

</bundles_post_ra>
